<compile_context>
chip_gen: v5e
topology: v5e:2x2
jax: 0.10.0
libtpu: 0.0.40
codegen_flags: <defaults>
</compile_context>

<pallas_src>
import jax
import jax.numpy as jnp
from jax.experimental import pallas as pl
from jax.experimental.pallas import tpu as pltpu

_LANE = 128
_MAX_T_HW = 32768
_EPS = 1e-6


def _feature_l2_norm_kernel(x_ref, o_ref):
    # x_ref / o_ref: (B_T, C, T_HW) VMEM tiles; reduce over C (axis=1).
    # NOTE: the C reduction must stay fully in-tile; edge-block correctness
    # relies on it (a future C-splitting change would break that).
    xf = x_ref[...].astype(jnp.float32)
    sumsq = jnp.sum(xf * xf, axis=1, keepdims=True)        # (B_T, 1, T_HW) f32
    inv_norm = jax.lax.rsqrt(sumsq + _EPS)                  # 1/sqrt(sum + eps)
    # Scale in f32, cast once to the output dtype (better accuracy for bf16
    # inputs; no bf16-VALU dependence on v5e).
    o_ref[...] = (xf * inv_norm).astype(o_ref.dtype)


def _round_up(x, m):
    return ((x + m - 1) // m) * m


def _largest_dividing_tile(hw, t_max):
    """Largest multiple of 128 that divides hw and is <= t_max (or None)."""
    t = (t_max // _LANE) * _LANE
    while t >= _LANE:
        if hw % t == 0:
            return t
        t -= _LANE
    return None


def _choose_tiles(B, C, HW, itemsize, target_block_bytes):
    """Pick (b_t, t_hw) so one block is ~target_block_bytes of *padded* VMEM
    layout, lane-dense, and (when cheap) t_hw evenly divides HW."""
    # Sublane packing: 8 rows/vreg for 32-bit, 16 for 16-bit, 32 for 8-bit.
    pack = max(8, 32 // max(1, itemsize))
    padded_c = _round_up(C, pack)
    bytes_per_lane_col = padded_c * itemsize * _LANE   # bytes per 128-lane column

    t_hw = (target_block_bytes // bytes_per_lane_col) * _LANE
    t_hw = max(_LANE, min(t_hw, _MAX_T_HW))
    if t_hw >= HW:
        t_hw = HW                                      # full extent: always legal
    else:
        # Prefer an evenly-dividing tile (unmasked vst on every block) as long
        # as it doesn't shrink the tile by more than 2x.
        div = _largest_dividing_tile(HW, t_hw)
        if div is not None and div >= max(_LANE, t_hw // 2):
            t_hw = div
    n_hw = pl.cdiv(HW, t_hw)

    padded_hw = _round_up(t_hw, _LANE)
    block_bytes = padded_c * padded_hw * itemsize      # padded bytes, b_t = 1

    b_t = 1
    if n_hw == 1 and block_bytes < target_block_bytes:
        # Whole spatial extent fits in one small tile: block several batches
        # per step to amortize per-grid-step overhead ...
        b_t = int(min(B, max(1, target_block_bytes // block_bytes)))
        # ... but keep at least 2 grid steps when possible so both v7x
        # TensorCores get work on the "parallel" batch axis.
        if B >= 2:
            b_t = min(b_t, pl.cdiv(B, 2))
        b_t = max(1, b_t)
    n_b = pl.cdiv(B, b_t)
    return b_t, t_hw, n_b, n_hw, b_t * block_bytes


def feature_l2_norm(feature, *, target_block_bytes=4 * 1024 * 1024):
    """feature: (B, C, H, W) array (NCHW, matching the PyTorch module)."""
    B, C, H, W = feature.shape
    HW = H * W
    itemsize = jnp.dtype(feature.dtype).itemsize
    x = feature.reshape(B, C, HW)

    b_t, t_hw, n_b, n_hw, block_bytes = _choose_tiles(
        B, C, HW, itemsize, target_block_bytes)

    # Resident VMEM ~= double-buffered input + output blocks (+ slack).
    # Clamp to a limit that is safe on v5e/v6e (128 MiB physical) and v7x
    # (64 MiB physical); v5e needs an explicit raise over its 16 MiB default.
    vmem_limit = int(min(48 * 1024 * 1024,
                         max(32 * 1024 * 1024, 6 * block_bytes)))

    cost = pl.CostEstimate(
        flops=3 * B * C * HW,                  # square + accumulate + scale
        transcendentals=B * HW,                # one rsqrt per spatial position
        bytes_accessed=2 * B * C * HW * itemsize,
    )

    out = pl.pallas_call(
        _feature_l2_norm_kernel,
        out_shape=jax.ShapeDtypeStruct((B, C, HW), feature.dtype),
        grid_spec=pltpu.PrefetchScalarGridSpec(
            num_scalar_prefetch=0,
            grid=(n_b, n_hw),
            in_specs=[pl.BlockSpec((b_t, C, t_hw), lambda b, s: (b, 0, s))],
            out_specs=pl.BlockSpec((b_t, C, t_hw), lambda b, s: (b, 0, s)),
        ),
        compiler_params=pltpu.CompilerParams(
            dimension_semantics=("parallel", "parallel"),
            vmem_limit_bytes=vmem_limit,
        ),
        cost_estimate=cost,
    )(x)

    return out.reshape(B, C, H, W)


if __name__ == "__main__":
    key = jax.random.PRNGKey(0)
    B, C, H, W = 2, 4, 16, 16
    feature = jax.random.normal(key, (B, C, H, W), dtype=jnp.float32)

    out = feature_l2_norm(feature)
    out = jax.block_until_ready(out)

    # reference check (plain JAX, mirrors the PyTorch forward)
    norm = jnp.sqrt(jnp.sum(feature ** 2, axis=1, keepdims=True) + 1e-6)
    ref = feature / norm
    assert out.shape == feature.shape
    assert jnp.allclose(out, ref, atol=1e-5, rtol=1e-5)

    # bf16 path sanity check (f32 internal math, single cast on store)
    feature_bf16 = feature.astype(jnp.bfloat16)
    out_bf16 = jax.block_until_ready(feature_l2_norm(feature_bf16))
    ref_bf16 = (feature_bf16.astype(jnp.float32)
                / jnp.sqrt(jnp.sum(feature_bf16.astype(jnp.float32) ** 2,
                                   axis=1, keepdims=True) + 1e-6))
    assert jnp.allclose(out_bf16.astype(jnp.float32), ref_bf16,
                        atol=2e-2, rtol=2e-2)

    print("KERNEL_OK")
</pallas_src>

<mosaic_0001>
module attributes {stable_mosaic.version = 11 : i64} {
  func.func @_feature_l2_norm_kernel(%arg0: i32, %arg1: i32, %arg2: memref<1x4x256xf32, #tpu.memory_space<vmem>>, %arg3: memref<1x4x256xf32, #tpu.memory_space<vmem>>) attributes {dimension_semantics = [#tpu.dimension_semantics<parallel>, #tpu.dimension_semantics<parallel>], iteration_bounds = array<i64: 2, 1>, scalar_prefetch = 0 : i64, scratch_operands = 0 : i64, tpu.core_type = #tpu.core_type<tc>, window_params = [{transform_indices = @transform_0, window_bounds = array<i64: 1, 4, 256>}, {transform_indices = @transform_1, window_bounds = array<i64: 1, 4, 256>}]} {
    %c0 = arith.constant 0 : index
    %c0_0 = arith.constant 0 : index
    %c0_1 = arith.constant 0 : index
    %0 = vector.load %arg2[%c0, %c0_0, %c0_1] : memref<1x4x256xf32, #tpu.memory_space<vmem>>, vector<1x4x256xf32>
    %1 = arith.mulf %0, %0 : vector<1x4x256xf32>
    %cst = arith.constant dense<0.000000e+00> : vector<1x256xf32>
    %2 = vector.multi_reduction <add>, %1, %cst [1] : vector<1x4x256xf32> to vector<1x256xf32>
    %3 = vector.shape_cast %2 : vector<1x256xf32> to vector<1x1x256xf32>
    %cst_2 = arith.constant 9.99999997E-7 : f32
    %4 = vector.broadcast %cst_2 : f32 to vector<1x1x256xf32>
    %5 = arith.addf %3, %4 : vector<1x1x256xf32>
    %6 = math.rsqrt %5 : vector<1x1x256xf32>
    %7 = vector.broadcast %6 : vector<1x1x256xf32> to vector<1x4x256xf32>
    %8 = arith.mulf %0, %7 : vector<1x4x256xf32>
    %c0_3 = arith.constant 0 : index
    %c0_4 = arith.constant 0 : index
    %c0_5 = arith.constant 0 : index
    %9 = vector.load %arg3[%c0_3, %c0_4, %c0_5] : memref<1x4x256xf32, #tpu.memory_space<vmem>>, vector<1x4x256xf32>
    tpu.vector_store %arg3[%c0_3, %c0_4, %c0_5], %8 {strides = array<i32>} : memref<1x4x256xf32, #tpu.memory_space<vmem>>, vector<1x4x256xf32>,
    return
  }
  func.func @transform_0(%arg0: i32, %arg1: i32) -> (i32, i32, i32) {
    %c0_i32 = arith.constant 0 : i32
    %c0_i32_0 = arith.constant 0 : i32
    return %arg0, %c0_i32, %arg1 : i32, i32, i32
  }
  func.func @transform_1(%arg0: i32, %arg1: i32) -> (i32, i32, i32) {
    %c0_i32 = arith.constant 0 : i32
    %c0_i32_0 = arith.constant 0 : i32
    return %arg0, %c0_i32, %arg1 : i32, i32, i32
  }
}

</mosaic_0001>

<bundles_post_ra>
// kernel: tpu_custom_call.1
= control target key start
LH: loop header
LB: loop body
LE: loop exit
PB: predicated region body
PF: predicated region fallthrough
CT: control target
= control target key end

     0   :  { %6 = vsyncpa [#allocation3], 0  ;;  %s644_s0 = inlined_call_operand.hbm [shape: f32[2,4,256], index: 0, kind: input, shape index: {}]   ;;  %s645_s1 = inlined_call_operand.hbm [shape: f32[2,4,256], index: 1, kind: output, shape index: {}]  }
   0x1   :  { %8 = vsyncpa [#allocation3 + $0x1], 0 }
   0x2   :  { %9 = vsyncpa [#allocation4], 0 }
   0x3   :  { %11 = vsyncpa [#allocation4 + $0x1], 0  ;;  %s517_s6 = smov 0   ;;  %s519_s7 = smov 0  }
   0x4   :  { %s521_s8 = smov 0   ;;  %s523_s9 = smov 0  }
   0x5   :  { %s525_s10 = smov 0   ;;  %s527_s11 = smov 0  }
   0x6 LB: > { %s310_s12 = sadd.s32 4294967295, %s505_s11   ;;  %s311_s13 = sadd.s32 4294967294, %s505_s11   ;;  %s505_s11 = sphi %s527_s11, %s17_s11   ;;  %s501_s10 = sphi %s525_s10, %s654_s10   ;;  %s497_s9 = sphi %s523_s9, %s653_s9   ;;  %s493_s8 = sphi %s521_s8, %s652_s8   ;;  %s489_s7 = sphi %s519_s7, %s651_s7   ;;  %s485_s6 = sphi %s517_s6, %s650_s6  }
   0x7   : > { %s29_s14 = sadd.s32 1, %s501_s10  ;;  %s38_s15 = sadd.s32 1, %s493_s8 }
   0x8   : > { %p31_p0 = scmp.ge.s32.totalorder %s29_s14, 2  ;;  %p45_p1 = scmp.ne.s32.totalorder %s493_s8, %s489_s7 }
   0x9   : > { %p46_p2 = scmp.eq.s32.totalorder %s505_s11, 0  ;;  %p51_p3 = scmp.ne.s32.totalorder %s489_s7, %s485_s6 }
   0xa   : > { %s656_s14 = smov (%p31_p0, %s29_s14), 0  ;;  %p52_p5 = scmp.eq.s32.totalorder %s310_s12, 0 }
   0xb   : > { %p558_p4 = por %p46_p2, %p45_p1  ;;  %s33_s17 = ssub.s32 %s501_s10, %s656_s14 }
   0xc   : > { %p77_p6 = scmp.eq.s32.totalorder %s310_s12, 1  ;;  %p36_p7 = scmp.eq.s32.totalorder %s33_s17, 0 }
   0xd   : > { %p564_p8 = por %p52_p5, %p51_p3  ;;  %p83_p10 = scmp.eq.s32.totalorder %s311_s13, 1 }
   0xe   : > { %p568_p9 = por %p77_p6, %p45_p1  ;;  %p313_p12 = scmp.ge.s32.totalorder %s505_s11, 2 }
   0xf   : > { %s573_s20 = scalar_select %p36_p7, %s493_s8, %s38_s15  }
  0x10   : > { %p575_p11 = por %p83_p10, %p51_p3  ;;  %p339_p13 = scmp.lt.s32.totalorder %s505_s11, 2 }
  0x11   : > { %s103_s22 = sand.u32 1, %s493_s8   ;;  %s325_s24 = sshll.u32 %s501_s10, 3 }
  0x12   : > { %s314_s23 = sshll.u32 %s103_s22, 3  ;;  %s114_s27 = scalar_lea.hbm %s644_s0, %s325_s24 }
  0x13   : > { %s107_s28 = scalar_lea.vmem [#allocation2], %s314_s23  ;;  %s116_s30 = sshll.u32 %s114_s27, 4  ;;  %s117_s30 = int_to_ptr.hbm [resolvable:$true] %s116_s30 }
  0x14   : > { %s118_s29 = sshll.u32 %s107_s28, 4  ;;  %p332_p0 = pnand %p339_p13, %p558_p4  ;;  %s119_s29 = int_to_ptr.vmem [resolvable:$true] %s118_s29 }
  0x15   : > { %p317_p1 = scmp.ge.s32.totalorder %s505_s11, 1  ;;  %p123_p2 = scmp.lt.s32.totalorder %s505_s11, 3 }
  0x16   : > { %s104_s2 = scalar_lea.sflag [#allocation3], %s103_s22 }
  0x17   : > { %334 = dma.hbm_to_vmem [thread:$0]  (!%p332_p0), %s117_s30, 128, %s119_s29, %s104_s2  }
  0x18   : > { %p124_p3 = pnand %p317_p1, %p123_p2 }
  0x19   : > { %s591_s3 = sand.u32 (!%p124_p3), 1, %s489_s7  }
  0x1a   : > { %127 = sbr.rel (%p124_p3) target bundleno = 85 (0x55), region = 24  ;;  %s318_s4 = sshll.u32 (!%p124_p3), %s591_s3, 3 }
  0x1b   : > { %s130_s5 = scalar_lea.sflag (!%p124_p3), [#allocation3], %s591_s3  ;;  %s133_s12 = scalar_lea.vmem (!%p124_p3), [#allocation2], %s318_s4 }
  0x1f   : > { %476 = dma.done.wait (%p564_p8), %s130_s5, 128  }
  0x20   : > { %478 = vsyncadd (%p564_p8), %s130_s5, 4294967168  ;;  %v155_v0 = vld [vmem:[%s133_s12] sm:$0xff]  ;;  %vm163_vm0 = vcmask 1043456   ;;  %s326_s13 = sshll.u32 %s497_s9, 3  ;;  %s152_s18 = scalar_lea.vmem [#allocation5], %s318_s4 }
  0x21   : > { %v156_v1 = vmul.f32 %v155_v0, %v155_v0  ;;  %s221_s17 = scalar_lea.hbm %s645_s1, %s326_s13  ;;  %s223_s9 = sshll.u32 %s152_s18, 4  ;;  %s224_s9 = int_to_ptr.vmem [resolvable:$true] %s223_s9 }
  0x22   : > { %s225_s22 = sshll.u32 %s221_s17, 4  ;;  %s208_s23 = scalar_lea.sflag [#allocation4], %s591_s3  ;;  %s226_s22 = int_to_ptr.hbm [resolvable:$true] %s225_s22 }
  0x23   : > { %158 = vst [vmem:[#allocation1] ss:$2 sm:$0xff] %v156_v1  ;;  %s437_s24 = sshra.s32 %s226_s22, 4  ;;  %s443_s28 = scalar_lea.hbm %s645_s1, 16  ;;  %s438_s24 = int_to_ptr.hbm [resolvable:$true] %s437_s24 }
  0x24   : > { %s439_s25 = scalar_lea.hbm %s438_s24, 8  ;;  %p444_p7 = scmp.lt.s32.totalorder %s438_s24, %s645_s1 }
  0x25   : > { %p440_p4 = scmp.ne.s32.totalorder %s438_s24, %s439_s25  ;;  %p445_p8 = scmp.lt.s32.totalorder %s443_s28, %s439_s25 }
  0x27   : > { %p441_p5 = pnand %p440_p4, %p568_p9  ;;  %p446_p10 = por %p445_p8, %p444_p7 }
  0x29   : > { %p442_p6 = pneg %p441_p5 }
  0x2a   : > { %v159_v2 = vld.sshfl [vmem:[#allocation1] sm:$0xff pattern:$0x75316420]  ;;  %v160_v3 = vld.sshfl [vmem:[#allocation1 + $0x8] sm:$0xff pattern:$0x75316420] }
  0x2b   : > { %v164_v4 = vsel %vm163_vm0, %v159_v2, 0.0  ;;  %v171_v5 = vsel %vm163_vm0, %v160_v3, 0.0  ;;  %p447_p13 = pnand %p446_p10, %p442_p6 }
  0x2c   : > { %v165_v6 = vrot.slane %v164_v4, 4  ;;  %v172_v7 = vrot.slane %v171_v5, 4 }
  0x2e   : > { %v166_v8 = vadd.f32 %v165_v6, %v164_v4  ;;  %v173_v9 = vadd.f32 %v172_v7, %v171_v5 }
  0x30   : > { %v167_v10 = vrot.slane %v166_v8, 2  ;;  %v174_v11 = vrot.slane %v173_v9, 2 }
  0x32   : > { %v168_v12 = vadd.f32 %v167_v10, %v166_v8  ;;  %v175_v13 = vadd.f32 %v174_v11, %v173_v9 }
  0x34   : > { %v169_v14 = vrot.slane %v168_v12, 1  ;;  %v176_v15 = vrot.slane %v175_v13, 1 }
  0x36   : > { %v170_v16 = vadd.f32 %v169_v14, %v168_v12  ;;  %v177_v17 = vadd.f32 %v176_v15, %v175_v13 }
  0x38   : > { %v178_v18 = vadd.f32 1e-06, %v170_v16  ;;  %v179_v19 = vadd.f32 1e-06, %v177_v17 }
  0x3a   : > { %389 = vrsqrt.f32 %v178_v18  ;;  %vm196_vm3 = vweird.f32 %v179_v19  ;;  %vm186_vm5 = vweird.f32 %v178_v18 }
  0x3b   : > { %391 = vrsqrt.f32 %v179_v19 }
  0x40   : > { %v390_v20 = vpop.eup %389 }
  0x41   : > { %v392_v21 = vpop.eup %391  ;;  %v181_v22 = vmul.f32 %v390_v20, %v178_v18  ;;  %vm187_vm2 = vweird.f32 %v390_v20 }
  0x42   : > { %v191_v23 = vmul.f32 %v392_v21, %v179_v19  ;;  %vm197_vm1 = vweird.f32 %v392_v21  ;;  %vm188_vm6 = vmor %vm186_vm5, %vm187_vm2 }
  0x43   : > { %v182_v24 = vmul.f32 %v390_v20, %v181_v22  ;;  %vm198_vm4 = vmor %vm196_vm3, %vm197_vm1 }
  0x44   : > { %v192_v25 = vmul.f32 %v392_v21, %v191_v23 }
  0x45   : > { %v183_v26 = vmul.f32 0.5, %v182_v24 }
  0x46   : > { %v193_v27 = vmul.f32 0.5, %v192_v25 }
  0x47   : > { %v184_v28 = vsub.f32 1.5, %v183_v26 }
  0x48   : > { %v194_v29 = vsub.f32 1.5, %v193_v27 }
  0x49   : > { %v185_v30 = vmul.f32 %v390_v20, %v184_v28 }
  0x4a   : > { %v195_v31 = vmul.f32 %v392_v21, %v194_v29 }
  0x4b   : > { %v189_v34 = vsel %vm188_vm6, %v390_v20, %v185_v30 }
  0x4c   : > { %v199_v32 = vsel %vm198_vm4, %v392_v21, %v195_v31 }
  0x4d   : > { %v202_v33 = vrot.slane %v199_v32, 4 }
  0x4f   : > { %v203_v35 = vsel %vm163_vm0, %v189_v34, %v202_v33 }
  0x50   : > { %v205_v36 = vmul.f32 %v203_v35, %v155_v0 }
  0x52   : > { %206 = vst [vmem:[%s152_s18] sm:$0xff] %v205_v36 }
  0x53   : > { %450 = shalt.err (!%p447_p13)
}
  0x54   : > { %329 = dma.vmem_to_hbm [thread:$0]  (%p568_p9), %s224_s9, 128, %s226_s22, %s208_s23  }
  0x55 PF: > { %s237_s2 = sand.u32 1, %s485_s6   ;;  %p336_p0 = pnand %p313_p12, %p575_p11 }
  0x56   : > { %s238_s3 = scalar_lea.sflag [#allocation4], %s237_s2 }
  0x57   : > { %p337_p1 = pneg %p336_p0 }
  0x59   : > { %480 = dma.done.wait (%p337_p1), %s238_s3, 128  }
  0x5a   : > { %482 = vsyncadd (%p337_p1), %s238_s3, 4294967168  ;;  %s17_s11 = sadd.s32 1, %s505_s11   ;;  %s650_s6 = smov %s489_s7 }
  0x5b   : > { %p14_p2 = scmp.ge.s32.totalorder %s17_s11, 4   ;;  %s651_s7 = smov %s493_s8 }
  0x5c   : > { %s652_s8 = smov %s573_s20  ;;  %s653_s9 = smov %s501_s10 }
  0x5d   : > { %s654_s10 = smov %s656_s14  ;;  %16 = sbr.rel (!%p14_p2) target bundleno = 6 (0x6), region = 69 }
  0x62   :  { %244 = vsyncpa [#allocation3], 1 }
  0x63   :  { %246 = vsyncpa [#allocation3 + $0x1], 1 }
  0x64   :  { %247 = vsyncpa [#allocation4], 1 }
  0x65   :  { %249 = vsyncpa [#allocation4 + $0x1], 1 }

</bundles_post_ra>
